<compile_context>
chip_gen: v6e
topology: v6e:2x2x1
jax: 0.10.0
libtpu: 0.0.40
codegen_flags: <defaults>
</compile_context>

<pallas_src>
import jax
import jax.numpy as jnp
from jax.experimental import pallas as pl
from jax.experimental.pallas import tpu as pltpu


# ---------------------------------------------------------------------------
# Kernel
# ---------------------------------------------------------------------------
def dense_block_kernel(x_ref, a1_ref, a2_ref, a3_ref, o_ref):
    # x_ref : (8, tile_b)   -- features on sublanes, batch on lanes
    # a1_ref: (16, 9)  = [W1 (16,8) | b1 (16,1)]
    # a2_ref: (8, 17)  = [W2' (8,16) | b2' (8,1)]        (BN1 folded in)
    # a3_ref: (2, 11)  = [W3' (2,8) | b3' | s3 | t3]     (BN2 folded in)
    # o_ref : (2, tile_b)
    x = x_ref[...]

    # layer 1: Linear(8 -> 16) + leaky_relu (post-affine folded into layer 2)
    h = jnp.dot(a1_ref[:, 0:8], x, preferred_element_type=jnp.float32)
    h = h + a1_ref[:, 8:9]
    h = jnp.maximum(h, 0.01 * h)

    # layer 2: Linear(16 -> 8) + leaky_relu (post-affine folded into layer 3)
    h = jnp.dot(a2_ref[:, 0:16], h, preferred_element_type=jnp.float32)
    h = h + a2_ref[:, 16:17]
    h = jnp.maximum(h, 0.01 * h)

    # layer 3: Linear(8 -> 2) + leaky_relu + final BN affine (2 features)
    h = jnp.dot(a3_ref[:, 0:8], h, preferred_element_type=jnp.float32)
    h = h + a3_ref[:, 8:9]
    h = jnp.maximum(h, 0.01 * h)
    h = h * a3_ref[:, 9:10] + a3_ref[:, 10:11]

    # 2-class softmax along the feature (sublane) axis via the sigmoid identity:
    #   p0 = 1/(1+exp(h1-h0)),  p1 = 1/(1+exp(h0-h1))
    d = h[1:2, :] - h[0:1, :]                       # (1, tile_b)
    z = jnp.concatenate([d, -d], axis=0)            # (2, tile_b)
    o_ref[...] = 1.0 / (1.0 + jnp.exp(z))


# ---------------------------------------------------------------------------
# Wrapper
# ---------------------------------------------------------------------------
def dense_block_forward(x, packed_params, *, tile_b=256):
    """x: (N, 8) float32.  Returns (N, 2) softmax probabilities."""
    N, F = x.shape
    assert F == 8
    assert N % tile_b == 0 and tile_b % 128 == 0
    a1, a2, a3 = packed_params

    xt = x.T  # (8, N) — lane-dense layout for the kernel (layout plumbing only)

    out_t = pl.pallas_call(
        dense_block_kernel,
        out_shape=jax.ShapeDtypeStruct((2, N), jnp.float32),
        grid_spec=pltpu.PrefetchScalarGridSpec(
            num_scalar_prefetch=0,
            grid=(N // tile_b,),
            in_specs=[
                pl.BlockSpec((8, tile_b), lambda i: (0, i)),      # x tile
                pl.BlockSpec(a1.shape, lambda i: (0, 0)),         # layer-1 slab
                pl.BlockSpec(a2.shape, lambda i: (0, 0)),         # layer-2 slab
                pl.BlockSpec(a3.shape, lambda i: (0, 0)),         # layer-3 slab
            ],
            out_specs=pl.BlockSpec((2, tile_b), lambda i: (0, i)),
        ),
        compiler_params=pltpu.CompilerParams(
            dimension_semantics=("parallel",)),
    )(xt, a1, a2, a3)

    return out_t.T  # (N, 2)


# ---------------------------------------------------------------------------
# Parameter construction / folding
# ---------------------------------------------------------------------------
def bn_affine(gamma, beta, mean, var, eps=1e-5):
    """Eval-mode BatchNorm1d -> affine (scale, shift)."""
    s = gamma / jnp.sqrt(var + eps)
    return s, beta - mean * s


def init_raw_params(key, hidden_one=16, hidden_two=8):
    ks = iter(jax.random.split(key, 26))

    def lin(fan_in, fan_out):
        bound = 1.0 / jnp.sqrt(fan_in)
        w = jax.random.uniform(next(ks), (fan_out, fan_in), jnp.float32, -bound, bound)
        b = jax.random.uniform(next(ks), (fan_out,), jnp.float32, -bound, bound)
        return w, b

    def bn(feat):
        gamma = 1.0 + 0.1 * jax.random.normal(next(ks), (feat,), jnp.float32)
        beta = 0.1 * jax.random.normal(next(ks), (feat,), jnp.float32)
        mean = 0.1 * jax.random.normal(next(ks), (feat,), jnp.float32)
        var = 0.5 + jnp.abs(jax.random.normal(next(ks), (feat,), jnp.float32))
        return gamma, beta, mean, var

    w1, b1 = lin(8, hidden_one)
    bn_in = bn(hidden_one)      # DenseWrapper('input').batch_norm
    bn1 = bn(hidden_one)        # DenseBlock.batch_norm1
    w2, b2 = lin(hidden_one, hidden_two)
    bn_hid = bn(hidden_two)     # DenseWrapper('hidden').batch_norm
    bn2 = bn(hidden_two)        # DenseBlock.batch_norm2
    w3, b3 = lin(hidden_two, 2)
    bn_out = bn(2)              # DenseWrapper('output').batch_norm

    return dict(w1=w1, b1=b1, bn_in=bn_in, bn1=bn1,
                w2=w2, b2=b2, bn_hid=bn_hid, bn2=bn2,
                w3=w3, b3=b3, bn_out=bn_out)


def fold_params(p):
    """Fold BN affines of layers 1/2 into the next Linear; pack per-layer slabs."""
    s1a, t1a = bn_affine(*p["bn_in"])
    s1b, t1b = bn_affine(*p["bn1"])
    s1, t1 = s1a * s1b, t1a * s1b + t1b     # wrapper BN then batch_norm1

    s2a, t2a = bn_affine(*p["bn_hid"])
    s2b, t2b = bn_affine(*p["bn2"])
    s2, t2 = s2a * s2b, t2a * s2b + t2b     # wrapper BN then batch_norm2

    s3, t3 = bn_affine(*p["bn_out"])

    w1, b1 = p["w1"], p["b1"]
    w2f = p["w2"] * s1[None, :]             # fold (s1, t1) into Linear 2
    b2f = p["w2"] @ t1 + p["b2"]
    w3f = p["w3"] * s2[None, :]             # fold (s2, t2) into Linear 3
    b3f = p["w3"] @ t2 + p["b3"]

    a1 = jnp.concatenate([w1, b1[:, None]], axis=1)                     # (16, 9)
    a2 = jnp.concatenate([w2f, b2f[:, None]], axis=1)                   # (8, 17)
    a3 = jnp.concatenate([w3f, b3f[:, None], s3[:, None], t3[:, None]],
                         axis=1)                                        # (2, 11)
    return a1, a2, a3


# ---------------------------------------------------------------------------
# Pure-JAX reference (unfolded params, exercises the whole folding path)
# ---------------------------------------------------------------------------
def reference_forward(x, p, eps=1e-5):
    lrelu = lambda h: jnp.where(h > 0, h, 0.01 * h)

    def bn(h, stats):
        g, b, m, v = stats
        return (h - m) / jnp.sqrt(v + eps) * g + b

    h = bn(bn(lrelu(x @ p["w1"].T + p["b1"]), p["bn_in"]), p["bn1"])
    h = bn(bn(lrelu(h @ p["w2"].T + p["b2"]), p["bn_hid"]), p["bn2"])
    h = bn(lrelu(h @ p["w3"].T + p["b3"]), p["bn_out"])
    return jax.nn.softmax(h, axis=1)


if __name__ == "__main__":
    key = jax.random.PRNGKey(0)
    k_x, k_p = jax.random.split(key)

    N = 1024  # batch — lane-dense tiles of 256 rows, 4 parallel grid steps
    x = jax.random.normal(k_x, (N, 8), jnp.float32)

    raw = init_raw_params(k_p)
    packed = fold_params(raw)

    out = dense_block_forward(x, packed, tile_b=256)
    out = jax.block_until_ready(out)

    ref = reference_forward(x, raw)
    assert out.shape == (N, 2)
    max_err = float(jnp.max(jnp.abs(out - ref)))
    assert jnp.allclose(out, ref, atol=1e-4, rtol=1e-4), f"mismatch vs reference (max err {max_err})"
    assert jnp.allclose(jnp.sum(out, axis=1), 1.0, atol=1e-5), "softmax rows must sum to 1"

    print("KERNEL_OK")
</pallas_src>

<mosaic_0001>
module attributes {stable_mosaic.version = 11 : i64} {
  func.func @dense_block_kernel(%arg0: i32, %arg1: memref<8x256xf32, #tpu.memory_space<vmem>>, %arg2: memref<16x9xf32, #tpu.memory_space<vmem>>, %arg3: memref<8x17xf32, #tpu.memory_space<vmem>>, %arg4: memref<2x11xf32, #tpu.memory_space<vmem>>, %arg5: memref<2x256xf32, #tpu.memory_space<vmem>>) attributes {dimension_semantics = [#tpu.dimension_semantics<parallel>], iteration_bounds = array<i64: 4>, scalar_prefetch = 0 : i64, scratch_operands = 0 : i64, tpu.core_type = #tpu.core_type<tc>, window_params = [{transform_indices = @transform_0, window_bounds = array<i64: 8, 256>}, {pipeline_mode = #tpu.pipeline_mode<synchronous>, transform_indices = @transform_1, window_bounds = array<i64: 16, 9>}, {pipeline_mode = #tpu.pipeline_mode<synchronous>, transform_indices = @transform_2, window_bounds = array<i64: 8, 17>}, {pipeline_mode = #tpu.pipeline_mode<synchronous>, transform_indices = @transform_3, window_bounds = array<i64: 2, 11>}, {transform_indices = @transform_4, window_bounds = array<i64: 2, 256>}]} {
    %c0 = arith.constant 0 : index
    %c0_0 = arith.constant 0 : index
    %0 = vector.load %arg1[%c0, %c0_0] : memref<8x256xf32, #tpu.memory_space<vmem>>, vector<8x256xf32>
    %c0_1 = arith.constant 0 : index
    %c0_2 = arith.constant 0 : index
    %1 = vector.load %arg2[%c0_1, %c0_2] : memref<16x9xf32, #tpu.memory_space<vmem>>, vector<16x8xf32>
    %cst = arith.constant dense<0.000000e+00> : vector<16x256xf32>
    %2 = tpu.matmul %1, %0, %cst {dimension_numbers = #tpu.dot_dimension_numbers<[1], [0], [0], [1], [0, 0, 1, 1], [], []>} : vector<16x8xf32>, vector<8x256xf32>, vector<16x256xf32> -> vector<16x256xf32>
    %c0_3 = arith.constant 0 : index
    %c8 = arith.constant 8 : index
    %3 = vector.load %arg2[%c0_3, %c8] : memref<16x9xf32, #tpu.memory_space<vmem>>, vector<16x1xf32>
    %4 = vector.broadcast %3 : vector<16x1xf32> to vector<16x256xf32>
    %5 = arith.addf %2, %4 : vector<16x256xf32>
    %cst_4 = arith.constant 0.00999999977 : f32
    %6 = vector.broadcast %cst_4 : f32 to vector<16x256xf32>
    %7 = arith.mulf %6, %5 : vector<16x256xf32>
    %8 = arith.maximumf %5, %7 : vector<16x256xf32>
    %c0_5 = arith.constant 0 : index
    %c0_6 = arith.constant 0 : index
    %9 = vector.load %arg3[%c0_5, %c0_6] : memref<8x17xf32, #tpu.memory_space<vmem>>, vector<8x16xf32>
    %cst_7 = arith.constant dense<0.000000e+00> : vector<8x256xf32>
    %10 = tpu.matmul %9, %8, %cst_7 {dimension_numbers = #tpu.dot_dimension_numbers<[1], [0], [0], [1], [0, 0, 1, 1], [], []>} : vector<8x16xf32>, vector<16x256xf32>, vector<8x256xf32> -> vector<8x256xf32>
    %c0_8 = arith.constant 0 : index
    %c16 = arith.constant 16 : index
    %11 = vector.load %arg3[%c0_8, %c16] : memref<8x17xf32, #tpu.memory_space<vmem>>, vector<8x1xf32>
    %12 = vector.broadcast %11 : vector<8x1xf32> to vector<8x256xf32>
    %13 = arith.addf %10, %12 : vector<8x256xf32>
    %cst_9 = arith.constant 0.00999999977 : f32
    %14 = vector.broadcast %cst_9 : f32 to vector<8x256xf32>
    %15 = arith.mulf %14, %13 : vector<8x256xf32>
    %16 = arith.maximumf %13, %15 : vector<8x256xf32>
    %c0_10 = arith.constant 0 : index
    %c0_11 = arith.constant 0 : index
    %17 = vector.load %arg4[%c0_10, %c0_11] : memref<2x11xf32, #tpu.memory_space<vmem>>, vector<2x8xf32>
    %cst_12 = arith.constant dense<0.000000e+00> : vector<2x256xf32>
    %18 = tpu.matmul %17, %16, %cst_12 {dimension_numbers = #tpu.dot_dimension_numbers<[1], [0], [0], [1], [0, 0, 1, 1], [], []>} : vector<2x8xf32>, vector<8x256xf32>, vector<2x256xf32> -> vector<2x256xf32>
    %c0_13 = arith.constant 0 : index
    %c8_14 = arith.constant 8 : index
    %19 = vector.load %arg4[%c0_13, %c8_14] : memref<2x11xf32, #tpu.memory_space<vmem>>, vector<2x1xf32>
    %20 = vector.broadcast %19 : vector<2x1xf32> to vector<2x256xf32>
    %21 = arith.addf %18, %20 : vector<2x256xf32>
    %cst_15 = arith.constant 0.00999999977 : f32
    %22 = vector.broadcast %cst_15 : f32 to vector<2x256xf32>
    %23 = arith.mulf %22, %21 : vector<2x256xf32>
    %24 = arith.maximumf %21, %23 : vector<2x256xf32>
    %c0_16 = arith.constant 0 : index
    %c9 = arith.constant 9 : index
    %25 = vector.load %arg4[%c0_16, %c9] : memref<2x11xf32, #tpu.memory_space<vmem>>, vector<2x1xf32>
    %26 = vector.broadcast %25 : vector<2x1xf32> to vector<2x256xf32>
    %27 = arith.mulf %24, %26 : vector<2x256xf32>
    %c0_17 = arith.constant 0 : index
    %c10 = arith.constant 10 : index
    %28 = vector.load %arg4[%c0_17, %c10] : memref<2x11xf32, #tpu.memory_space<vmem>>, vector<2x1xf32>
    %29 = vector.broadcast %28 : vector<2x1xf32> to vector<2x256xf32>
    %30 = arith.addf %27, %29 : vector<2x256xf32>
    %31 = vector.extract_strided_slice %30 {offsets = [1, 0], sizes = [1, 256], strides = [1, 1]} : vector<2x256xf32> to vector<1x256xf32>
    %32 = vector.extract_strided_slice %30 {offsets = [0, 0], sizes = [1, 256], strides = [1, 1]} : vector<2x256xf32> to vector<1x256xf32>
    %33 = arith.subf %31, %32 : vector<1x256xf32>
    %cst_18 = arith.constant 0.000000e+00 : f32
    %34 = vector.broadcast %cst_18 : f32 to vector<1x256xf32>
    %35 = arith.subf %34, %33 : vector<1x256xf32>
    %36 = tpu.concatenate %33, %35 in 0 : vector<1x256xf32>, vector<1x256xf32> -> vector<2x256xf32>
    %37 = math.exp %36 : vector<2x256xf32>
    %cst_19 = arith.constant 1.000000e+00 : f32
    %38 = vector.broadcast %cst_19 : f32 to vector<2x256xf32>
    %39 = arith.addf %38, %37 : vector<2x256xf32>
    %cst_20 = arith.constant 1.000000e+00 : f32
    %40 = vector.broadcast %cst_20 : f32 to vector<2x256xf32>
    %41 = arith.divf %40, %39 : vector<2x256xf32>
    %c0_21 = arith.constant 0 : index
    %c0_22 = arith.constant 0 : index
    %42 = vector.load %arg5[%c0_21, %c0_22] : memref<2x256xf32, #tpu.memory_space<vmem>>, vector<2x256xf32>
    tpu.vector_store %arg5[%c0_21, %c0_22], %41 {strides = array<i32>} : memref<2x256xf32, #tpu.memory_space<vmem>>, vector<2x256xf32>,
    return
  }
  func.func @transform_0(%arg0: i32) -> (i32, i32) {
    %c0_i32 = arith.constant 0 : i32
    %c0_i32_0 = arith.constant 0 : i32
    return %c0_i32, %arg0 : i32, i32
  }
  func.func @transform_1(%arg0: i32) -> (i32, i32) {
    %c0_i32 = arith.constant 0 : i32
    %c0_i32_0 = arith.constant 0 : i32
    %c0_i32_1 = arith.constant 0 : i32
    return %c0_i32, %c0_i32_0 : i32, i32
  }
  func.func @transform_2(%arg0: i32) -> (i32, i32) {
    %c0_i32 = arith.constant 0 : i32
    %c0_i32_0 = arith.constant 0 : i32
    %c0_i32_1 = arith.constant 0 : i32
    return %c0_i32, %c0_i32_0 : i32, i32
  }
  func.func @transform_3(%arg0: i32) -> (i32, i32) {
    %c0_i32 = arith.constant 0 : i32
    %c0_i32_0 = arith.constant 0 : i32
    %c0_i32_1 = arith.constant 0 : i32
    return %c0_i32, %c0_i32_0 : i32, i32
  }
  func.func @transform_4(%arg0: i32) -> (i32, i32) {
    %c0_i32 = arith.constant 0 : i32
    %c0_i32_0 = arith.constant 0 : i32
    return %c0_i32, %arg0 : i32, i32
  }
}

</mosaic_0001>

<bundles_post_ra>
// kernel: tpu_custom_call.1
= control target key start
LH: loop header
LB: loop body
LE: loop exit
PB: predicated region body
PF: predicated region fallthrough
CT: control target
= control target key end

     0   :  { %9 = vsyncpa [#allocation3], 0  ;;  %s1140_s0 = inlined_call_operand.hbm [shape: f32[8,1024], index: 0, kind: input, shape index: {}]   ;;  %s1141_s1 = inlined_call_operand.hbm [shape: f32[16,9], index: 1, kind: input, shape index: {}]   ;;  %s1142_s2 = inlined_call_operand.hbm [shape: f32[8,17], index: 2, kind: input, shape index: {}]   ;;  %s1143_s3 = inlined_call_operand.vmem [shape: f32[2,11], index: 3, kind: input, shape index: {}]   ;;  %s1144_s4 = inlined_call_operand.hbm [shape: f32[2,1024], index: 4, kind: output, shape index: {}]  }
   0x1   :  { %11 = vsyncpa [#allocation3 + $0x1], 0 }
   0x2   :  { %12 = vsyncpa [#allocation6], 0 }
   0x3   :  { %13 = vsyncpa [#allocation4], 0 }
   0x4   :  { %15 = vsyncpa [#allocation4 + $0x1], 0  ;;  %s970_s15 = smov 0   ;;  %s972_s16 = smov 0  }
   0x5   :  { %s974_s17 = smov 0   ;;  %s976_s18 = smov 0  }
   0x6 LB: > { %s991_s19 = sadd.s32 4294967295, %s932_s18   ;;  %s671_s20 = sadd.s32 4294967294, %s932_s18   ;;  %s932_s18 = sphi %s976_s18, %s1165_s18   ;;  %s928_s17 = sphi %s974_s17, %s1164_s17   ;;  %s924_s16 = sphi %s972_s16, %s1163_s16   ;;  %s920_s15 = sphi %s970_s15, %s1162_s15  }
   0x7   : > { %p41_p0 = scmp.ne.s32.totalorder %s924_s16, %s920_s15  ;;  %p1145_p1 = scmp.eq.s32.totalorder %s991_s19, 0 }
   0x8   : > { %p134_p3 = scmp.eq.s32.totalorder %s671_s20, 3  ;;  %p672_p5 = scmp.ge.s32.totalorder %s932_s18, 1 }
   0x9   : > { %p1000_p4 = por %p1145_p1, %p41_p0  ;;  %p141_p7 = scmp.lt.s32.totalorder %s932_s18, 5 }
   0xa   : > { %p1005_p6 = por %p134_p3, %p41_p0  ;;  %s934_s24 = smov [#allocation5]  }
   0xb   : > { %s1149_s21 = scalar_select %p1000_p4, 1, 0 }
   0xc   : > { %s1150_s22 = scalar_select %p1005_p6, 1, 0 }
   0xd   : > { %p1010_p8 = pnand %p672_p5, %p141_p7  ;;  %s153_s25 = sshll.u32 %s934_s24, 4  ;;  %s154_s25 = int_to_ptr.vmem [resolvable:$true] %s153_s25 }
   0xe   : > { %s935_s27 = smov [#allocation7]   ;;  %s795_s29 = scalar_lea.vmem %s154_s25, 256 }
   0xf   : > { %s1151_s23 = scalar_select %p1010_p8, 1, 0 }
  0x10   : > { %p708_p9 = pneg %p1010_p8  ;;  %s167_s28 = sshll.u32 %s935_s27, 4  ;;  %s168_s28 = int_to_ptr.vmem [resolvable:$true] %s167_s28 }
  0x11   : > { %p796_p12 = scmp.ne.s32.totalorder %s154_s25, %s795_s29  ;;  %p803_p3 = scmp.lt.s32.totalorder %s154_s25, %s154_s25 }
  0x12   : > { %p1018_p10 = pnand %p708_p9, %p1145_p1  ;;  %p804_p5 = scmp.lt.s32.totalorder %s795_s29, %s795_s29 }
  0x14   : > { %p786_p11 = pneg %p1018_p10  ;;  %p805_p7 = por %p804_p5, %p803_p3 }
  0x16   : > { %p798_p13 = pnand %p796_p12, %p786_p11 }
  0x18   : > { %p799_p0 = pneg %p798_p13 }
  0x1a   : > { %p806_p9 = pnand %p805_p7, %p799_p0 }
  0x1c   : > { %809 = shalt.err (!%p806_p9)
}
  0x1d   : > { %s936_s30 = smov 128   ;;  %s937_s5 = smov 8  }
  0x1e   : > { %711 = dma.hbm_to_vmem [thread:$0]  (!%p1018_p10), %s1141_s1, 256, %s154_s25, [#allocation6], %s936_s30, %s936_s30, %s937_s5  }
  0x1f   : > { %s821_s8 = scalar_lea.vmem %s168_s28, 128  ;;  %p829_p2 = scmp.lt.s32.totalorder %s168_s28, %s168_s28 }
  0x20   : > { %p822_p1 = scmp.ne.s32.totalorder %s168_s28, %s821_s8  ;;  %p830_p6 = scmp.lt.s32.totalorder %s821_s8, %s821_s8 }
  0x22   : > { %p824_p12 = pnand %p822_p1, %p786_p11  ;;  %p831_p3 = por %p830_p6, %p829_p2 }
  0x24   : > { %p825_p13 = pneg %p824_p12 }
  0x26   : > { %p832_p0 = pnand %p831_p3, %p825_p13 }
  0x28   : > { %835 = shalt.err (!%p832_p0)
}
  0x29   : > { %714 = dma.hbm_to_vmem [thread:$0]  (!%p1018_p10), %s1142_s2, 128, %s168_s28, [#allocation6]  }
  0x2a   : > { %s1041_s11 = sadd.s32 1, %s932_s18   ;;  %s28_s12 = sadd.s32 1, %s928_s17 }
  0x2b   : > { %s25_s13 = ssub.s32 %s932_s18, %s1041_s11  ;;  %p35_p1 = scmp.ne.s32.totalorder %s928_s17, %s924_s16 }
  0x2c   : > { %p26_p2 = scmp.eq.s32.totalorder %s25_s13, 0  ;;  %p36_p6 = scmp.eq.s32.totalorder %s932_s18, 0 }
  0x2d   : > { %p1153_p11 = scmp.eq.s32.totalorder %s991_s19, 3  ;;  %p725_p7 = scmp.lt.s32.totalorder %s932_s18, 4 }
  0x2e   : > { %s1057_s20 = scalar_select %p26_p2, %s928_s17, %s28_s12  }
  0x2f   : > { %p1051_p5 = por %p1153_p11, %p35_p1  ;;  %p37_p9 = por %p36_p6, %p35_p1 }
  0x30   : > { %s181_s24 = sand.u32 1, %s928_s17   ;;  %s694_s26 = sshll.u32 %s932_s18, 8 }
  0x31   : > { %s1154_s14 = scalar_select %p1051_p5, 1, 0 }
  0x32   : > { %s676_s25 = sshll.u32 %s181_s24, 4  ;;  %s1064_s29 = scalar_lea.hbm %s1140_s0, %s694_s26 }
  0x33   : > { %s185_s30 = scalar_lea.vmem [#allocation2], %s676_s25  ;;  %p1066_p10 = pnand %p725_p7, %p37_p9 }
  0x34   : > { %s193_s5 = sshll.u32 %s185_s30, 4  ;;  %s182_s7 = scalar_lea.sflag [#allocation3], %s181_s24  ;;  %s194_s5 = int_to_ptr.vmem [resolvable:$true] %s193_s5 }
  0x35   : > { %s836_s8 = scalar_lea.hbm %s1064_s29, 256  ;;  %p838_p13 = pneg %p1066_p10 }
  0x36   : > { %p837_p12 = scmp.ne.s32.totalorder %s1064_s29, %s836_s8  ;;  %s841_s12 = scalar_lea.hbm %s1140_s0, 1024 }
  0x37   : > { %p842_p1 = scmp.lt.s32.totalorder %s1064_s29, %s1140_s0  ;;  %p843_p2 = scmp.lt.s32.totalorder %s841_s12, %s836_s8 }
  0x38   : > { %p839_p3 = pnand %p838_p13, %p837_p12 }
  0x39   : > { %p844_p6 = por %p843_p2, %p842_p1 }
  0x3a   : > { %p840_p0 = pneg %p839_p3 }
  0x3c   : > { %p845_p11 = pnand %p844_p6, %p840_p0 }
  0x3e   : > { %848 = shalt.err (!%p845_p11)
}
  0x3f   : > { %s849_s26 = scalar_lea.vmem %s194_s5, 256  ;;  %s938_s24 = smov [#allocation2]  }
  0x40   : > { %p850_p7 = scmp.ne.s32.totalorder %s194_s5, %s849_s26  ;;  %s854_s27 = sshll.u32 %s938_s24, 4  ;;  %s855_s27 = int_to_ptr.vmem [resolvable:$false] %s854_s27 }
  0x41   : > { %s856_s28 = scalar_lea.vmem %s855_s27, 512  ;;  %p857_p12 = scmp.lt.s32.totalorder %s194_s5, %s855_s27 }
  0x42   : > { %p852_p9 = pnand %p850_p7, %p838_p13  ;;  %p858_p3 = scmp.lt.s32.totalorder %s856_s28, %s849_s26 }
  0x44   : > { %p853_p5 = pneg %p852_p9  ;;  %p859_p4 = por %p858_p3, %p857_p12 }
  0x46   : > { %p860_p8 = pnand %p859_p4, %p853_p5 }
  0x48   : > { %863 = shalt.err (!%p860_p8)
}
  0x49   : > { %718 = dma.hbm_to_vmem [thread:$0]  (!%p1066_p10), %s1064_s29, 256, %s194_s5, %s182_s7  }
  0x4a   : > { %p1156_p0 = scmp.ne.s32.totalorder %s1151_s23, 0 }
  0x4b   : > { %s1087_s30 = sand.u32 (!%p1156_p0), 1, %s924_s16   ;;  %p1157_p13 = scmp.ne.s32.totalorder (!%p1156_p0), %s1149_s21, 0 }
  0x4c   : > { %202 = sbr.rel (%p1156_p0) target bundleno = 760 (0x2f8), region = 36  ;;  %s680_s8 = sshll.u32 (!%p1156_p0), %s1087_s30, 4 }
  0x4d   : > { %s205_s9 = scalar_lea.sflag (!%p1156_p0), [#allocation3], %s1087_s30  ;;  %s208_s10 = scalar_lea.vmem (!%p1156_p0), [#allocation2], %s680_s8 }
  0x51   : > { %907 = dma.done.wait (%p1157_p13), %s205_s9, 256  }
  0x52   : > { %909 = vsyncadd (%p1157_p13), %s205_s9, 4294967040  ;;  %p1158_p4 = scmp.eq.s32.totalorder %s991_s19, 0 }
  0x54   : > { %911 = dma.done.wait (%p1158_p4), [#allocation6], 384   ;;  %p1159_p8 = pmov %p1158_p4 }
  0x55   : > { %v939_v0 = vmov 0.0   ;;  %v940_v1 = vmov 8   ;;  %v244_v2 = vld [vmem:[%s208_s10 + $0x8] sm:$0xff]  ;;  %v243_v3 = vld [vmem:[%s208_s10] sm:$0xff]  ;;  %vm257_vm0 = vcmask 64512   ;;  %v941_v7 = vmov 16  }
  0x56   : > { %913 = vsyncadd (%p1159_p8), [#allocation6], 4294966912  ;;  %326 = vmatprep.mubr.f32.mxu0 %v939_v0  ;;  %770 = vset.pattern.permute.xlu0 %v940_v1  ;;  %v245_v4 = vld [vmem:[#allocation5] sm:$0xff]  ;;  %v246_v5 = vld [vmem:[#allocation5 + $0x8] sm:$0xff]  ;;  %vm353_vm1 = vcmask 130048   ;;  %v942_v27 = vmov 9  }
  0x57   : > { %420 = vmatprep.mubr.f32.mxu1 %v939_v0  ;;  %292 = vmatprep.subr.mxu0 %v244_v2  ;;  %v347_v6 = vld [vmem:[#allocation7] sm:$0xff]  ;;  %v431_v26 = vld [vmem:[%s1143_s3] sm:$0x3]  ;;  %v943_v28 = vmov 10   ;;  %vm542_vm2 = vcmask 1040384   ;;  %s683_s29 = sshll.u32 %s1087_s30, 2 }
  0x58   : > { %293 = vmatpush1.msra.mxu0 %v243_v3  ;;  %254 = vperm.xlu0 %770, %v246_v5   ;;  %s695_s5 = sshll.u32 %s991_s19, 6  ;;  %s240_s6 = scalar_lea.vmem [#allocation8], %s683_s29 }
  0x59   : > { %684 = vmatmul.mubr.msk.f32.vlgmr.msra.gmra.mxu0 %vm257_vm0, %v245_v4  ;;  %771 = vset.pattern.permute.xlu1 %v941_v7  ;;  %s582_s7 = sshll.u32 %s240_s6, 4  ;;  %s580_s25 = scalar_lea.hbm %s1144_s4, %s695_s5  ;;  %s583_s7 = int_to_ptr.vmem [resolvable:$true] %s582_s7 }
  0x5a   : > { %332 = vmatprep.mubr.f32.mxu0 %v939_v0  ;;  %350 = vperm.xlu1 %771, %v347_v6   ;;  %s568_s26 = scalar_lea.sflag [#allocation4], %s1087_s30  ;;  %s864_s24 = scalar_lea.vmem %s583_s7, 64 }
  0x5b   : > { %p865_p5 = scmp.ne.s32.totalorder %s583_s7, %s864_s24  ;;  %p1160_p10 = scmp.ne.s32.totalorder %s1154_s14, 0 }
  0x5c   : > { %249 = vperm.xlu0 %770, %v245_v4   ;;  %s944_s27 = smov [#allocation8]  }
  0x5d   : > { %685 = vmatmul.mubr.msk.f32.gmra.mxu0 %vm257_vm0, %v246_v5  ;;  %p866_p1 = pnand %p865_p5, %p1160_p10  ;;  %s868_s28 = sshll.u32 %s944_s27, 4  ;;  %s869_s28 = int_to_ptr.vmem [resolvable:$false] %s868_s28 }
  0x5e   : > { %772 = vset.pattern.permute.xlu1 %v940_v1  ;;  %s870_s19 = scalar_lea.vmem %s869_s28, 128  ;;  %p871_p6 = scmp.lt.s32.totalorder %s583_s7, %s869_s28 }
  0x5f   : > { %434 = vperm.xlu1 %772, %v431_v26   ;;  %p867_p2 = pneg %p866_p1  ;;  %p872_p11 = scmp.lt.s32.totalorder %s870_s19, %s864_s24 }
  0x60   : > { %773 = vset.pattern.permute.xlu0 %v942_v27 }
  0x61   : > { %515 = vperm.xlu0 %773, %v431_v26   ;;  %p873_p7 = por %p872_p11, %p871_p6 }
  0x63   : > { %774 = vset.pattern.permute.xlu1 %v943_v28  ;;  %p874_p9 = pnand %p873_p7, %p867_p2 }
  0x64   : > { %521 = vperm.xlu1 %774, %v431_v26  }
  0x65   : > { %775 = vset.pattern.permute.xlu0 %v943_v28 }
  0xd3   : > { %v255_v8 = vpop.permute.xlu0 %254 }
  0xd5   : > { %v351_v29 = vpop.permute.xlu1 %350 }
  0xd7   : > { %v250_v11 = vpop.permute.xlu0 %249 }
  0xda   : > { %v435_v38 = vpop.permute.xlu1 %434 }
  0xdc   : > { %v516_v44 = vpop.permute.xlu0 %515 }
  0xdf   : > { %v522_v47 = vpop.permute.xlu1 %521 }
 0x119   : > { %v328_v9 = vpop.f32.mrf.mxu0 }
 0x11a   : > { %v329_v15 = vadd.f32 %v328_v9, %v250_v11 }
 0x11b   : > { %v330_v10 = vpop.f32.mrf.mxu0 }
 0x11c   : > { %v331_v13 = vadd.f32 %v330_v10, %v250_v11  ;;  %v339_v21 = vmul.f32 0.01, %v329_v15 }
 0x11d   : > { %v334_v12 = vpop.f32.mrf.mxu0 }
 0x11e   : > { %v335_v14 = vadd.f32 %v334_v12, %v255_v8  ;;  %v340_v19 = vmul.f32 0.01, %v331_v13  ;;  %v343_v25 = vmax.f32 %v329_v15, %v339_v21 }
 0x11f   : > { %v336_v16 = vpop.f32.mrf.mxu0 }
 0x120   : > { %v337_v17 = vadd.f32 %v336_v16, %v255_v8  ;;  %v341_v18 = vmul.f32 0.01, %v335_v14  ;;  %v344_v24 = vmax.f32 %v331_v13, %v340_v19 }
 0x122   : > { %v342_v20 = vmul.f32 0.01, %v337_v17  ;;  %v345_v23 = vmax.f32 %v335_v14, %v341_v18 }
 0x124   : > { %v346_v22 = vmax.f32 %v337_v17, %v342_v20 }
 0x126   : > { %384 = vmatprep.subr.mxu1 %v346_v22 }
 0x127   : > { %385 = vmatpush1.msra.mxu1 %v345_v23 }
 0x128   : > { %386 = vmatprep.subr.mxu1 %v344_v24 }
 0x129   : > { %387 = vmatpush1.msra.mxu1 %v343_v25 }
 0x12a   : > { %686 = vmatmul.mubr.msk.f32.vlgmr.msra.gmra.mxu1 %vm353_vm1, %v347_v6 }
 0x12b   : > { %503 = vmatprep.mubr.f32.mxu1 %v939_v0 }
 0x1ea   : > { %v422_v30 = vpop.f32.mrf.mxu1 }
 0x1eb   : > { %v423_v31 = vadd.f32 %v422_v30, %v351_v29 }
 0x1ec   : > { %v424_v32 = vpop.f32.mrf.mxu1 }
 0x1ed   : > { %v425_v33 = vadd.f32 %v424_v32, %v351_v29  ;;  %v427_v34 = vmul.f32 0.01, %v423_v31 }
 0x1ef   : > { %v428_v35 = vmul.f32 0.01, %v425_v33  ;;  %v429_v37 = vmax.f32 %v423_v31, %v427_v34 }
 0x1f1   : > { %v430_v36 = vmax.f32 %v425_v33, %v428_v35 }
 0x1f3   : > { %469 = vmatprep.subr.mxu1 %v430_v36 }
 0x1f4   : > { %470 = vmatpush1.msra.mxu1 %v429_v37 }
 0x1f5   : > { %687 = vmatmul.mubr.msk.f32.vlgmr.msra.gmra.mxu1 %vm257_vm0, %v431_v26 }
 0x2b5   : > { %v505_v39 = vpop.f32.mrf.mxu1 }
 0x2b6   : > { %v506_v40 = vadd.f32 %v505_v39, %v435_v38 }
 0x2b7   : > { %v507_v41 = vpop.f32.mrf.mxu1 }
 0x2b8   : > { %v510_v42 = vmul.f32 0.01, %v506_v40  ;;  %v508_v43 = vadd.f32 %v507_v41, %v435_v38 }
 0x2ba   : > { %v511_v45 = vmul.f32 0.01, %v508_v43  ;;  %v512_v46 = vmax.f32 %v506_v40, %v510_v42 }
 0x2bc   : > { %v513_v48 = vmax.f32 %v508_v43, %v511_v45  ;;  %v518_v49 = vmul.f32 %v516_v44, %v512_v46 }
 0x2be   : > { %v519_v50 = vmul.f32 %v516_v44, %v513_v48  ;;  %v524_v51 = vadd.f32 %v522_v47, %v518_v49 }
 0x2c0   : > { %v525_v52 = vadd.f32 %v522_v47, %v519_v50  ;;  %v528_v53 = vrot.slane %v524_v51, 7 }
 0x2c2   : > { %v529_v54 = vrot.slane %v525_v52, 7  ;;  %v532_v55 = vsub.f32 %v524_v51, %v528_v53 }
 0x2c4   : > { %v533_v56 = vsub.f32 %v525_v52, %v529_v54  ;;  %v534_v57 = vsub.f32 0.0, %v532_v55  ;;  %v538_v58 = vrot.slane %v532_v55, 1 }
 0x2c6   : > { %v535_v59 = vsub.f32 0.0, %v533_v56  ;;  %v539_v60 = vrot.slane %v533_v56, 1  ;;  %v543_v61 = vsel %vm542_vm2, %v538_v58, %v534_v57 }
 0x2c7   : > { %v545_v62 = vmul.f32 1.442695, %v543_v61 }
 0x2c8   : > { %v544_v63 = vsel %vm542_vm2, %v539_v60, %v535_v59 }
 0x2c9   : > { %776 = vpow2.f32 %v545_v62  ;;  %v547_v0 = vmul.f32 1.442695, %v544_v63 }
 0x2cb   : > { %778 = vpow2.f32 %v547_v0 }
 0x2d6   : > { %v777_v1 = vpop.eup %776 }
 0x2d7   : > { %v549_v2 = vadd.f32 1.0, %v777_v1 }
 0x2d8   : > { %v779_v3 = vpop.eup %778 }
 0x2d9   : > { %v550_v4 = vadd.f32 1.0, %v779_v3  ;;  %780 = vrcp.f32 %v549_v2 }
 0x2db   : > { %782 = vrcp.f32 %v550_v4 }
 0x2e6   : > { %v781_v5 = vpop.eup %780 }
 0x2e8   : > { %v783_v6 = vpop.eup %782 }
 0x2e9   : > { %v557_v7 = vcombine.low %v781_v5, %v783_v6 }
 0x2eb   : > { %688 = vst.sshfl [vmem:[%s240_s6] sm:$0x33 pattern:$0x76325410] %v557_v7 }
 0x2ec   : > { %877 = shalt.err (!%p874_p9)
}
 0x2ed   : > { %s878_s8 = scalar_lea.hbm %s580_s25, 64  ;;  %s882_s10 = scalar_lea.hbm %s1144_s4, 256 }
 0x2ee   : > { %p879_p12 = scmp.ne.s32.totalorder %s580_s25, %s878_s8  ;;  %p883_p13 = scmp.lt.s32.totalorder %s580_s25, %s1144_s4 }
 0x2ef   : > { %p884_p4 = scmp.lt.s32.totalorder %s882_s10, %s878_s8 }
 0x2f0   : > { %p880_p3 = pnand %p879_p12, %p1160_p10 }
 0x2f1   : > { %p885_p8 = por %p884_p4, %p883_p13 }
 0x2f2   : > { %p881_p0 = pneg %p880_p3 }
 0x2f4   : > { %p886_p5 = pnand %p885_p8, %p881_p0 }
 0x2f6   : > { %889 = shalt.err (!%p886_p5)
}
 0x2f7   : > { %706 = dma.vmem_to_hbm [thread:$0]  (%p1160_p10), %s583_s7, 64, %s580_s25, %s568_s26  }
 0x2f8 PF: > { %p728_p1 = scmp.ge.s32.totalorder %s932_s18, 2  ;;  %s594_s29 = sand.u32 1, %s920_s15  }
 0x2f9   : > { %p1161_p2 = scmp.ne.s32.totalorder %s1150_s22, 0  ;;  %s595_s5 = scalar_lea.sflag [#allocation4], %s594_s29 }
 0x2fb   : > { %p720_p6 = pnand %p728_p1, %p1161_p2 }
 0x2fd   : > { %p721_p11 = pneg %p720_p6 }
 0x2ff   : > { %915 = dma.done.wait (%p721_p11), %s595_s5, 64  }
 0x300   : > { %917 = vsyncadd (%p721_p11), %s595_s5, 4294967232  ;;  %p18_p7 = scmp.ge.s32.totalorder %s1041_s11, 6   ;;  %s1162_s15 = smov %s924_s16 }
 0x301   : > { %s1163_s16 = smov %s928_s17  ;;  %s1164_s17 = smov %s1057_s20 }
 0x302   : > { %s1165_s18 = smov %s1041_s11  ;;  %20 = sbr.rel (!%p18_p7) target bundleno = 6 (0x6), region = 89 }
 0x307   :  { %600 = vsyncpa [#allocation3], 1 }
 0x308   :  { %602 = vsyncpa [#allocation3 + $0x1], 1 }
 0x309   :  { %603 = vsyncpa [#allocation6], 1 }
 0x30a   :  { %604 = vsyncpa [#allocation4], 1 }
 0x30b   :  { %606 = vsyncpa [#allocation4 + $0x1], 1 }

</bundles_post_ra>
